<compile_context>
chip_gen: v5e
topology: v5e:2x2
jax: 0.10.0
libtpu: 0.0.40
codegen_flags: <defaults>
</compile_context>

<pallas_src>
import jax
import jax.numpy as jnp
from jax import lax
from jax.experimental import pallas as pl
from jax.experimental.pallas import tpu as pltpu

EMB_SIZE = 16
HIDDEN = 128
BILSTM_HIDDEN = 2 * 128   # 256
LEAKY_SLOPE = 0.01        # PyTorch F.leaky_relu default
E_LANE = 128              # event-logit lane padding (full lane width)
NEG_INF = -1e30


def _round_up(n, m):
    return (n + m - 1) // m * m


def _trigger_kernel(init_idx_ref,       # SMEM (1,)  int32
                    x_ref,              # VMEM (T, 256)
                    emb_table_ref,      # VMEM (E_rows, 16)      rows zero-padded
                    w1x_ref,            # VMEM (256, 128)
                    w1e_ref,            # VMEM (16, 128)
                    b1_ref,             # VMEM (1, 128)
                    w2_ref,             # VMEM (128, E_LANE)     pad cols = 0
                    b2_ref,             # VMEM (1, E_LANE)       pad cols = -1e30
                    ner_out_ref,        # VMEM (T, E_LANE)  out  (log-softmax rows)
                    ner_idx_ref,        # SMEM (T,) int32   out
                    cand_ref):          # VMEM scratch (T*E_rows, E_LANE)
    T = x_ref.shape[0]
    E_rows = emb_table_ref.shape[0]

    # ---------- hoisted batched pre-work (everything off the serial path) ----
    pre = (jnp.dot(x_ref[...], w1x_ref[...],
                   preferred_element_type=jnp.float32) + b1_ref[...])        # (T,128)
    contrib = jnp.dot(emb_table_ref[...], w1e_ref[...],
                      preferred_element_type=jnp.float32)                    # (E_rows,128)

    # Candidate hidden state for every (timestep, previous-event) pair.
    h = pre[:, None, :] + contrib[None, :, :]                                # (T,E_rows,128)
    h = jnp.where(h > 0, h, LEAKY_SLOPE * h)                                 # leaky_relu
    h2 = h.reshape(T * E_rows, HIDDEN)
    # One big MXU matmul instead of T tiny (1,128)x(128,128) matmuls.
    cand_ref[...] = (jnp.dot(h2, w2_ref[...],
                             preferred_element_type=jnp.float32) + b2_ref[...])

    lane_iota = lax.broadcasted_iota(jnp.int32, (1, E_LANE), 1)  # hoisted broadcast

    # ---------- serial greedy decode: row lookup + argmax only ---------------
    def step(i, prev):
        row = cand_ref[pl.ds(i * E_rows + prev, 1), :]                       # (1,128)
        # argmax on raw logits (== argmax of log_softmax); first max wins,
        # matching PyTorch's list.index(max(row)).  Padded lanes are -1e30.
        row_max = jnp.max(row, axis=-1, keepdims=True)
        idx = jnp.min(jnp.where(row == row_max, lane_iota,
                                jnp.int32(E_LANE))).astype(jnp.int32)
        ner_out_ref[pl.ds(i, 1), :] = row                                    # lane-dense store
        ner_idx_ref[i] = idx
        return idx

    unroll = True if T <= 32 else 8
    lax.fori_loop(0, T, step, init_idx_ref[0], unroll=unroll)

    # ---------- batched log-softmax over the whole (T, E_LANE) block ---------
    logits_all = ner_out_ref[...]
    m = jnp.max(logits_all, axis=-1, keepdims=True)
    z = logits_all - m
    ner_out_ref[...] = z - jnp.log(jnp.sum(jnp.exp(z), axis=-1, keepdims=True))


def trigger_recognition_pallas(bilstm_output, params, init_event_index=0):
    """bilstm_output: (T, 1, 256) float32.  Returns (ner_output, ner_emb, ner_index)."""
    T = bilstm_output.shape[0]
    E = params["emb_table"].shape[0]
    assert E <= E_LANE, "event_dim must fit in one padded lane group"
    E_rows = _round_up(E, 8)

    x = bilstm_output.reshape(T, BILSTM_HIDDEN).astype(jnp.float32)
    emb_table = params["emb_table"].astype(jnp.float32)

    emb_pad = jnp.zeros((E_rows, EMB_SIZE), jnp.float32).at[:E].set(emb_table)
    w2_pad = jnp.zeros((HIDDEN, E_LANE), jnp.float32).at[:, :E].set(
        params["w2"].astype(jnp.float32))
    b2_pad = jnp.full((1, E_LANE), NEG_INF, jnp.float32).at[:, :E].set(
        params["b2"].astype(jnp.float32))

    init_idx = jnp.asarray([init_event_index], jnp.int32)

    vmem = pl.BlockSpec(memory_space=pltpu.MemorySpace.VMEM)
    smem = pl.BlockSpec(memory_space=pltpu.MemorySpace.SMEM)

    # Rough scoped-VMEM budget (bytes) with headroom (everything resides in VMEM).
    vmem_bytes = 4 * (T * BILSTM_HIDDEN + T * E_LANE            # input + output
                      + 2 * T * E_rows * E_LANE                 # candidate logits + h
                      + E_rows * (EMB_SIZE + HIDDEN) + T * HIDDEN
                      + BILSTM_HIDDEN * HIDDEN + EMB_SIZE * HIDDEN
                      + HIDDEN * E_LANE + 2 * E_LANE + HIDDEN)
    vmem_limit = int(min(max(2 * vmem_bytes, 4 << 20), 100 << 20))

    ner_out_pad, ner_idx = pl.pallas_call(
        _trigger_kernel,
        out_shape=(
            jax.ShapeDtypeStruct((T, E_LANE), jnp.float32),   # padded log-softmax
            jax.ShapeDtypeStruct((T,), jnp.int32),            # chosen indices
        ),
        in_specs=[smem] + [vmem] * 7,
        out_specs=(vmem, smem),
        scratch_shapes=[
            pltpu.VMEM((T * E_rows, E_LANE), jnp.float32),    # all candidate logits
        ],
        compiler_params=pltpu.CompilerParams(vmem_limit_bytes=vmem_limit),
    )(init_idx, x, emb_pad,
      params["w1x"].astype(jnp.float32), params["w1e"].astype(jnp.float32),
      params["b1"].astype(jnp.float32), w2_pad, b2_pad)

    ner_out = ner_out_pad[:, :E]
    ner_emb = jnp.take(emb_table, ner_idx, axis=0).reshape(T, 1, EMB_SIZE)
    return ner_out, ner_emb, ner_idx


def make_params(key, event_dim):
    ks = jax.random.split(key, 6)
    scale = 0.1
    return {
        "emb_table": scale * jax.random.normal(ks[0], (event_dim, EMB_SIZE), jnp.float32),
        # Linear(272 -> 128) split into the bilstm part and the embedding part
        "w1x": scale * jax.random.normal(ks[1], (BILSTM_HIDDEN, HIDDEN), jnp.float32),
        "w1e": scale * jax.random.normal(ks[2], (EMB_SIZE, HIDDEN), jnp.float32),
        "b1": scale * jax.random.normal(ks[3], (1, HIDDEN), jnp.float32),
        # Linear(128 -> event_dim)
        "w2": scale * jax.random.normal(ks[4], (HIDDEN, event_dim), jnp.float32),
        "b2": scale * jax.random.normal(ks[5], (1, event_dim), jnp.float32),
    }


def trigger_recognition_ref(bilstm_output, params, init_event_index=0):
    """Pure-JAX reference of the same greedy loop (for correctness check)."""
    T = bilstm_output.shape[0]
    x = bilstm_output.reshape(T, BILSTM_HIDDEN)
    emb = params["emb_table"][init_event_index:init_event_index + 1]
    outs, embs, idxs = [], [], []
    for i in range(T):
        xi = x[i:i + 1]
        h = xi @ params["w1x"] + emb @ params["w1e"] + params["b1"]
        h = jnp.where(h > 0, h, LEAKY_SLOPE * h)
        logits = h @ params["w2"] + params["b2"]
        logp = jax.nn.log_softmax(logits, axis=1)
        idx = int(jnp.argmax(logp[0]))
        emb = params["emb_table"][idx:idx + 1]
        outs.append(logp)
        embs.append(emb.reshape(1, 1, EMB_SIZE))
        idxs.append(idx)
    return (jnp.concatenate(outs, 0), jnp.concatenate(embs, 0),
            jnp.array(idxs, jnp.int32))


if __name__ == "__main__":
    key = jax.random.PRNGKey(0)
    k_param, k_in = jax.random.split(key)

    EVENT_DIM = 10
    T = 8
    params = make_params(k_param, EVENT_DIM)
    bilstm_output = jax.random.normal(k_in, (T, 1, BILSTM_HIDDEN), jnp.float32)

    ner_out, ner_emb, ner_idx = trigger_recognition_pallas(bilstm_output, params, 0)
    jax.block_until_ready((ner_out, ner_emb, ner_idx))

    assert ner_out.shape == (T, EVENT_DIM)
    assert ner_emb.shape == (T, 1, EMB_SIZE)
    assert ner_idx.shape == (T,)

    ref_out, ref_emb, ref_idx = trigger_recognition_ref(bilstm_output, params, 0)
    assert jnp.allclose(ner_out, ref_out, atol=1e-4), "log-softmax mismatch"
    assert jnp.array_equal(ner_idx, ref_idx), "greedy index mismatch"
    assert jnp.allclose(ner_emb, ref_emb, atol=1e-5), "embedding mismatch"

    print("KERNEL_OK")
</pallas_src>

<mosaic_0001>
module attributes {stable_mosaic.version = 11 : i64} {
  func.func @_trigger_kernel(%arg0: memref<1xi32, #tpu.memory_space<smem>>, %arg1: memref<8x256xf32, #tpu.memory_space<vmem>>, %arg2: memref<16x16xf32, #tpu.memory_space<vmem>>, %arg3: memref<256x128xf32, #tpu.memory_space<vmem>>, %arg4: memref<16x128xf32, #tpu.memory_space<vmem>>, %arg5: memref<1x128xf32, #tpu.memory_space<vmem>>, %arg6: memref<128x128xf32, #tpu.memory_space<vmem>>, %arg7: memref<1x128xf32, #tpu.memory_space<vmem>>, %arg8: memref<8x128xf32, #tpu.memory_space<vmem>>, %arg9: memref<8xi32, #tpu.memory_space<smem>>, %arg10: memref<128x128xf32, #tpu.memory_space<vmem>>) attributes {dimension_semantics = [], scalar_prefetch = 0 : i64, scratch_operands = 1 : i64, tpu.core_type = #tpu.core_type<tc>} {
    %c0 = arith.constant 0 : index
    %c0_0 = arith.constant 0 : index
    %0 = vector.load %arg1[%c0, %c0_0] : memref<8x256xf32, #tpu.memory_space<vmem>>, vector<8x256xf32>
    %c0_1 = arith.constant 0 : index
    %c0_2 = arith.constant 0 : index
    %1 = vector.load %arg3[%c0_1, %c0_2] : memref<256x128xf32, #tpu.memory_space<vmem>>, vector<256x128xf32>
    %cst = arith.constant dense<0.000000e+00> : vector<8x128xf32>
    %2 = tpu.matmul %0, %1, %cst {dimension_numbers = #tpu.dot_dimension_numbers<[1], [0], [0], [1], [0, 0, 1, 1], [], []>} : vector<8x256xf32>, vector<256x128xf32>, vector<8x128xf32> -> vector<8x128xf32>
    %c0_3 = arith.constant 0 : index
    %c0_4 = arith.constant 0 : index
    %3 = vector.load %arg5[%c0_3, %c0_4] : memref<1x128xf32, #tpu.memory_space<vmem>>, vector<1x128xf32>
    %4 = vector.broadcast %3 : vector<1x128xf32> to vector<8x128xf32>
    %5 = arith.addf %2, %4 : vector<8x128xf32>
    %c0_5 = arith.constant 0 : index
    %c0_6 = arith.constant 0 : index
    %6 = vector.load %arg2[%c0_5, %c0_6] : memref<16x16xf32, #tpu.memory_space<vmem>>, vector<16x16xf32>
    %c0_7 = arith.constant 0 : index
    %c0_8 = arith.constant 0 : index
    %7 = vector.load %arg4[%c0_7, %c0_8] : memref<16x128xf32, #tpu.memory_space<vmem>>, vector<16x128xf32>
    %cst_9 = arith.constant dense<0.000000e+00> : vector<16x128xf32>
    %8 = tpu.matmul %6, %7, %cst_9 {dimension_numbers = #tpu.dot_dimension_numbers<[1], [0], [0], [1], [0, 0, 1, 1], [], []>} : vector<16x16xf32>, vector<16x128xf32>, vector<16x128xf32> -> vector<16x128xf32>
    %9 = vector.shape_cast %5 : vector<8x128xf32> to vector<8x1x128xf32>
    %10 = vector.shape_cast %8 : vector<16x128xf32> to vector<1x16x128xf32>
    %11 = vector.broadcast %9 : vector<8x1x128xf32> to vector<8x16x128xf32>
    %12 = vector.broadcast %10 : vector<1x16x128xf32> to vector<8x16x128xf32>
    %13 = arith.addf %11, %12 : vector<8x16x128xf32>
    %cst_10 = arith.constant 0.000000e+00 : f32
    %14 = vector.broadcast %cst_10 : f32 to vector<8x16x128xf32>
    %15 = arith.cmpf ogt, %13, %14 : vector<8x16x128xf32>
    %cst_11 = arith.constant 0.00999999977 : f32
    %16 = vector.broadcast %cst_11 : f32 to vector<8x16x128xf32>
    %17 = arith.mulf %16, %13 : vector<8x16x128xf32>
    %18 = arith.select %15, %13, %17 : vector<8x16x128xi1>, vector<8x16x128xf32>
    %19 = vector.shape_cast %18 : vector<8x16x128xf32> to vector<128x128xf32>
    %c0_12 = arith.constant 0 : index
    %c0_13 = arith.constant 0 : index
    %20 = vector.load %arg6[%c0_12, %c0_13] : memref<128x128xf32, #tpu.memory_space<vmem>>, vector<128x128xf32>
    %cst_14 = arith.constant dense<0.000000e+00> : vector<128x128xf32>
    %21 = tpu.matmul %19, %20, %cst_14 {dimension_numbers = #tpu.dot_dimension_numbers<[1], [0], [0], [1], [0, 0, 1, 1], [], []>} : vector<128x128xf32>, vector<128x128xf32>, vector<128x128xf32> -> vector<128x128xf32>
    %c0_15 = arith.constant 0 : index
    %c0_16 = arith.constant 0 : index
    %22 = vector.load %arg7[%c0_15, %c0_16] : memref<1x128xf32, #tpu.memory_space<vmem>>, vector<1x128xf32>
    %23 = vector.broadcast %22 : vector<1x128xf32> to vector<128x128xf32>
    %24 = arith.addf %21, %23 : vector<128x128xf32>
    %c0_17 = arith.constant 0 : index
    %c0_18 = arith.constant 0 : index
    %25 = vector.load %arg10[%c0_17, %c0_18] : memref<128x128xf32, #tpu.memory_space<vmem>>, vector<128x128xf32>
    tpu.vector_store %arg10[%c0_17, %c0_18], %24 {strides = array<i32>} : memref<128x128xf32, #tpu.memory_space<vmem>>, vector<128x128xf32>,
    %26 = tpu.iota {dimensions = array<i32: 1>} : vector<1x128xi32>
    %c0_19 = arith.constant 0 : index
    %27 = memref.load %arg0[%c0_19] : memref<1xi32, #tpu.memory_space<smem>>
    %c0_i32 = arith.constant 0 : i32
    %c16_i32 = arith.constant 16 : i32
    %28 = arith.muli %c0_i32, %c16_i32 : i32
    %29 = arith.addi %28, %27 : i32
    %30 = arith.index_cast %29 : i32 to index
    %c0_20 = arith.constant 0 : index
    %31 = vector.load %arg10[%30, %c0_20] : memref<128x128xf32, #tpu.memory_space<vmem>>, vector<1x128xf32>
    %cst_21 = arith.constant dense<0xFF800000> : vector<1xf32>
    %32 = vector.multi_reduction <maximumf>, %31, %cst_21 [1] : vector<1x128xf32> to vector<1xf32>
    %33 = vector.shape_cast %32 : vector<1xf32> to vector<1x1xf32>
    %34 = vector.broadcast %33 : vector<1x1xf32> to vector<1x128xf32>
    %35 = arith.cmpf oeq, %31, %34 : vector<1x128xf32>
    %c128_i32 = arith.constant 128 : i32
    %36 = vector.broadcast %c128_i32 : i32 to vector<1x128xi32>
    %37 = arith.select %35, %26, %36 : vector<1x128xi1>, vector<1x128xi32>
    %38 = vector.shape_cast %37 : vector<1x128xi32> to vector<1x1x128xi32>
    %cst_22 = arith.constant dense<2147483647> : vector<1xi32>
    %39 = vector.multi_reduction <minsi>, %38, %cst_22 [1, 2] : vector<1x1x128xi32> to vector<1xi32>
    %40 = vector.shape_cast %39 : vector<1xi32> to vector<1x1x1xi32>
    %41 = vector.extract %40[0, 0, 0] : i32 from vector<1x1x1xi32>
    %42 = arith.index_cast %c0_i32 : i32 to index
    %c0_23 = arith.constant 0 : index
    %43 = vector.load %arg8[%42, %c0_23] : memref<8x128xf32, #tpu.memory_space<vmem>>, vector<1x128xf32>
    tpu.vector_store %arg8[%42, %c0_23], %31 {strides = array<i32>} : memref<8x128xf32, #tpu.memory_space<vmem>>, vector<1x128xf32>,
    %44 = arith.index_cast %c0_i32 : i32 to index
    %45 = memref.load %arg9[%44] : memref<8xi32, #tpu.memory_space<smem>>
    memref.store %41, %arg9[%44] : memref<8xi32, #tpu.memory_space<smem>>
    %c1_i32 = arith.constant 1 : i32
    %c16_i32_24 = arith.constant 16 : i32
    %46 = arith.muli %c1_i32, %c16_i32_24 : i32
    %47 = arith.addi %46, %41 : i32
    %48 = arith.index_cast %47 : i32 to index
    %c0_25 = arith.constant 0 : index
    %49 = vector.load %arg10[%48, %c0_25] : memref<128x128xf32, #tpu.memory_space<vmem>>, vector<1x128xf32>
    %cst_26 = arith.constant dense<0xFF800000> : vector<1xf32>
    %50 = vector.multi_reduction <maximumf>, %49, %cst_26 [1] : vector<1x128xf32> to vector<1xf32>
    %51 = vector.shape_cast %50 : vector<1xf32> to vector<1x1xf32>
    %52 = vector.broadcast %51 : vector<1x1xf32> to vector<1x128xf32>
    %53 = arith.cmpf oeq, %49, %52 : vector<1x128xf32>
    %c128_i32_27 = arith.constant 128 : i32
    %54 = vector.broadcast %c128_i32_27 : i32 to vector<1x128xi32>
    %55 = arith.select %53, %26, %54 : vector<1x128xi1>, vector<1x128xi32>
    %56 = vector.shape_cast %55 : vector<1x128xi32> to vector<1x1x128xi32>
    %cst_28 = arith.constant dense<2147483647> : vector<1xi32>
    %57 = vector.multi_reduction <minsi>, %56, %cst_28 [1, 2] : vector<1x1x128xi32> to vector<1xi32>
    %58 = vector.shape_cast %57 : vector<1xi32> to vector<1x1x1xi32>
    %59 = vector.extract %58[0, 0, 0] : i32 from vector<1x1x1xi32>
    %60 = arith.index_cast %c1_i32 : i32 to index
    %c0_29 = arith.constant 0 : index
    %61 = vector.load %arg8[%60, %c0_29] : memref<8x128xf32, #tpu.memory_space<vmem>>, vector<1x128xf32>
    tpu.vector_store %arg8[%60, %c0_29], %49 {strides = array<i32>} : memref<8x128xf32, #tpu.memory_space<vmem>>, vector<1x128xf32>,
    %62 = arith.index_cast %c1_i32 : i32 to index
    %63 = memref.load %arg9[%62] : memref<8xi32, #tpu.memory_space<smem>>
    memref.store %59, %arg9[%62] : memref<8xi32, #tpu.memory_space<smem>>
    %c2_i32 = arith.constant 2 : i32
    %c16_i32_30 = arith.constant 16 : i32
    %64 = arith.muli %c2_i32, %c16_i32_30 : i32
    %65 = arith.addi %64, %59 : i32
    %66 = arith.index_cast %65 : i32 to index
    %c0_31 = arith.constant 0 : index
    %67 = vector.load %arg10[%66, %c0_31] : memref<128x128xf32, #tpu.memory_space<vmem>>, vector<1x128xf32>
    %cst_32 = arith.constant dense<0xFF800000> : vector<1xf32>
    %68 = vector.multi_reduction <maximumf>, %67, %cst_32 [1] : vector<1x128xf32> to vector<1xf32>
    %69 = vector.shape_cast %68 : vector<1xf32> to vector<1x1xf32>
    %70 = vector.broadcast %69 : vector<1x1xf32> to vector<1x128xf32>
    %71 = arith.cmpf oeq, %67, %70 : vector<1x128xf32>
    %c128_i32_33 = arith.constant 128 : i32
    %72 = vector.broadcast %c128_i32_33 : i32 to vector<1x128xi32>
    %73 = arith.select %71, %26, %72 : vector<1x128xi1>, vector<1x128xi32>
    %74 = vector.shape_cast %73 : vector<1x128xi32> to vector<1x1x128xi32>
    %cst_34 = arith.constant dense<2147483647> : vector<1xi32>
    %75 = vector.multi_reduction <minsi>, %74, %cst_34 [1, 2] : vector<1x1x128xi32> to vector<1xi32>
    %76 = vector.shape_cast %75 : vector<1xi32> to vector<1x1x1xi32>
    %77 = vector.extract %76[0, 0, 0] : i32 from vector<1x1x1xi32>
    %78 = arith.index_cast %c2_i32 : i32 to index
    %c0_35 = arith.constant 0 : index
    %79 = vector.load %arg8[%78, %c0_35] : memref<8x128xf32, #tpu.memory_space<vmem>>, vector<1x128xf32>
    tpu.vector_store %arg8[%78, %c0_35], %67 {strides = array<i32>} : memref<8x128xf32, #tpu.memory_space<vmem>>, vector<1x128xf32>,
    %80 = arith.index_cast %c2_i32 : i32 to index
    %81 = memref.load %arg9[%80] : memref<8xi32, #tpu.memory_space<smem>>
    memref.store %77, %arg9[%80] : memref<8xi32, #tpu.memory_space<smem>>
    %c3_i32 = arith.constant 3 : i32
    %c16_i32_36 = arith.constant 16 : i32
    %82 = arith.muli %c3_i32, %c16_i32_36 : i32
    %83 = arith.addi %82, %77 : i32
    %84 = arith.index_cast %83 : i32 to index
    %c0_37 = arith.constant 0 : index
    %85 = vector.load %arg10[%84, %c0_37] : memref<128x128xf32, #tpu.memory_space<vmem>>, vector<1x128xf32>
    %cst_38 = arith.constant dense<0xFF800000> : vector<1xf32>
    %86 = vector.multi_reduction <maximumf>, %85, %cst_38 [1] : vector<1x128xf32> to vector<1xf32>
    %87 = vector.shape_cast %86 : vector<1xf32> to vector<1x1xf32>
    %88 = vector.broadcast %87 : vector<1x1xf32> to vector<1x128xf32>
    %89 = arith.cmpf oeq, %85, %88 : vector<1x128xf32>
    %c128_i32_39 = arith.constant 128 : i32
    %90 = vector.broadcast %c128_i32_39 : i32 to vector<1x128xi32>
    %91 = arith.select %89, %26, %90 : vector<1x128xi1>, vector<1x128xi32>
    %92 = vector.shape_cast %91 : vector<1x128xi32> to vector<1x1x128xi32>
    %cst_40 = arith.constant dense<2147483647> : vector<1xi32>
    %93 = vector.multi_reduction <minsi>, %92, %cst_40 [1, 2] : vector<1x1x128xi32> to vector<1xi32>
    %94 = vector.shape_cast %93 : vector<1xi32> to vector<1x1x1xi32>
    %95 = vector.extract %94[0, 0, 0] : i32 from vector<1x1x1xi32>
    %96 = arith.index_cast %c3_i32 : i32 to index
    %c0_41 = arith.constant 0 : index
    %97 = vector.load %arg8[%96, %c0_41] : memref<8x128xf32, #tpu.memory_space<vmem>>, vector<1x128xf32>
    tpu.vector_store %arg8[%96, %c0_41], %85 {strides = array<i32>} : memref<8x128xf32, #tpu.memory_space<vmem>>, vector<1x128xf32>,
    %98 = arith.index_cast %c3_i32 : i32 to index
    %99 = memref.load %arg9[%98] : memref<8xi32, #tpu.memory_space<smem>>
    memref.store %95, %arg9[%98] : memref<8xi32, #tpu.memory_space<smem>>
    %c4_i32 = arith.constant 4 : i32
    %c16_i32_42 = arith.constant 16 : i32
    %100 = arith.muli %c4_i32, %c16_i32_42 : i32
    %101 = arith.addi %100, %95 : i32
    %102 = arith.index_cast %101 : i32 to index
    %c0_43 = arith.constant 0 : index
    %103 = vector.load %arg10[%102, %c0_43] : memref<128x128xf32, #tpu.memory_space<vmem>>, vector<1x128xf32>
    %cst_44 = arith.constant dense<0xFF800000> : vector<1xf32>
    %104 = vector.multi_reduction <maximumf>, %103, %cst_44 [1] : vector<1x128xf32> to vector<1xf32>
    %105 = vector.shape_cast %104 : vector<1xf32> to vector<1x1xf32>
    %106 = vector.broadcast %105 : vector<1x1xf32> to vector<1x128xf32>
    %107 = arith.cmpf oeq, %103, %106 : vector<1x128xf32>
    %c128_i32_45 = arith.constant 128 : i32
    %108 = vector.broadcast %c128_i32_45 : i32 to vector<1x128xi32>
    %109 = arith.select %107, %26, %108 : vector<1x128xi1>, vector<1x128xi32>
    %110 = vector.shape_cast %109 : vector<1x128xi32> to vector<1x1x128xi32>
    %cst_46 = arith.constant dense<2147483647> : vector<1xi32>
    %111 = vector.multi_reduction <minsi>, %110, %cst_46 [1, 2] : vector<1x1x128xi32> to vector<1xi32>
    %112 = vector.shape_cast %111 : vector<1xi32> to vector<1x1x1xi32>
    %113 = vector.extract %112[0, 0, 0] : i32 from vector<1x1x1xi32>
    %114 = arith.index_cast %c4_i32 : i32 to index
    %c0_47 = arith.constant 0 : index
    %115 = vector.load %arg8[%114, %c0_47] : memref<8x128xf32, #tpu.memory_space<vmem>>, vector<1x128xf32>
    tpu.vector_store %arg8[%114, %c0_47], %103 {strides = array<i32>} : memref<8x128xf32, #tpu.memory_space<vmem>>, vector<1x128xf32>,
    %116 = arith.index_cast %c4_i32 : i32 to index
    %117 = memref.load %arg9[%116] : memref<8xi32, #tpu.memory_space<smem>>
    memref.store %113, %arg9[%116] : memref<8xi32, #tpu.memory_space<smem>>
    %c5_i32 = arith.constant 5 : i32
    %c16_i32_48 = arith.constant 16 : i32
    %118 = arith.muli %c5_i32, %c16_i32_48 : i32
    %119 = arith.addi %118, %113 : i32
    %120 = arith.index_cast %119 : i32 to index
    %c0_49 = arith.constant 0 : index
    %121 = vector.load %arg10[%120, %c0_49] : memref<128x128xf32, #tpu.memory_space<vmem>>, vector<1x128xf32>
    %cst_50 = arith.constant dense<0xFF800000> : vector<1xf32>
    %122 = vector.multi_reduction <maximumf>, %121, %cst_50 [1] : vector<1x128xf32> to vector<1xf32>
    %123 = vector.shape_cast %122 : vector<1xf32> to vector<1x1xf32>
    %124 = vector.broadcast %123 : vector<1x1xf32> to vector<1x128xf32>
    %125 = arith.cmpf oeq, %121, %124 : vector<1x128xf32>
    %c128_i32_51 = arith.constant 128 : i32
    %126 = vector.broadcast %c128_i32_51 : i32 to vector<1x128xi32>
    %127 = arith.select %125, %26, %126 : vector<1x128xi1>, vector<1x128xi32>
    %128 = vector.shape_cast %127 : vector<1x128xi32> to vector<1x1x128xi32>
    %cst_52 = arith.constant dense<2147483647> : vector<1xi32>
    %129 = vector.multi_reduction <minsi>, %128, %cst_52 [1, 2] : vector<1x1x128xi32> to vector<1xi32>
    %130 = vector.shape_cast %129 : vector<1xi32> to vector<1x1x1xi32>
    %131 = vector.extract %130[0, 0, 0] : i32 from vector<1x1x1xi32>
    %132 = arith.index_cast %c5_i32 : i32 to index
    %c0_53 = arith.constant 0 : index
    %133 = vector.load %arg8[%132, %c0_53] : memref<8x128xf32, #tpu.memory_space<vmem>>, vector<1x128xf32>
    tpu.vector_store %arg8[%132, %c0_53], %121 {strides = array<i32>} : memref<8x128xf32, #tpu.memory_space<vmem>>, vector<1x128xf32>,
    %134 = arith.index_cast %c5_i32 : i32 to index
    %135 = memref.load %arg9[%134] : memref<8xi32, #tpu.memory_space<smem>>
    memref.store %131, %arg9[%134] : memref<8xi32, #tpu.memory_space<smem>>
    %c6_i32 = arith.constant 6 : i32
    %c16_i32_54 = arith.constant 16 : i32
    %136 = arith.muli %c6_i32, %c16_i32_54 : i32
    %137 = arith.addi %136, %131 : i32
    %138 = arith.index_cast %137 : i32 to index
    %c0_55 = arith.constant 0 : index
    %139 = vector.load %arg10[%138, %c0_55] : memref<128x128xf32, #tpu.memory_space<vmem>>, vector<1x128xf32>
    %cst_56 = arith.constant dense<0xFF800000> : vector<1xf32>
    %140 = vector.multi_reduction <maximumf>, %139, %cst_56 [1] : vector<1x128xf32> to vector<1xf32>
    %141 = vector.shape_cast %140 : vector<1xf32> to vector<1x1xf32>
    %142 = vector.broadcast %141 : vector<1x1xf32> to vector<1x128xf32>
    %143 = arith.cmpf oeq, %139, %142 : vector<1x128xf32>
    %c128_i32_57 = arith.constant 128 : i32
    %144 = vector.broadcast %c128_i32_57 : i32 to vector<1x128xi32>
    %145 = arith.select %143, %26, %144 : vector<1x128xi1>, vector<1x128xi32>
    %146 = vector.shape_cast %145 : vector<1x128xi32> to vector<1x1x128xi32>
    %cst_58 = arith.constant dense<2147483647> : vector<1xi32>
    %147 = vector.multi_reduction <minsi>, %146, %cst_58 [1, 2] : vector<1x1x128xi32> to vector<1xi32>
    %148 = vector.shape_cast %147 : vector<1xi32> to vector<1x1x1xi32>
    %149 = vector.extract %148[0, 0, 0] : i32 from vector<1x1x1xi32>
    %150 = arith.index_cast %c6_i32 : i32 to index
    %c0_59 = arith.constant 0 : index
    %151 = vector.load %arg8[%150, %c0_59] : memref<8x128xf32, #tpu.memory_space<vmem>>, vector<1x128xf32>
    tpu.vector_store %arg8[%150, %c0_59], %139 {strides = array<i32>} : memref<8x128xf32, #tpu.memory_space<vmem>>, vector<1x128xf32>,
    %152 = arith.index_cast %c6_i32 : i32 to index
    %153 = memref.load %arg9[%152] : memref<8xi32, #tpu.memory_space<smem>>
    memref.store %149, %arg9[%152] : memref<8xi32, #tpu.memory_space<smem>>
    %c7_i32 = arith.constant 7 : i32
    %c16_i32_60 = arith.constant 16 : i32
    %154 = arith.muli %c7_i32, %c16_i32_60 : i32
    %155 = arith.addi %154, %149 : i32
    %156 = arith.index_cast %155 : i32 to index
    %c0_61 = arith.constant 0 : index
    %157 = vector.load %arg10[%156, %c0_61] : memref<128x128xf32, #tpu.memory_space<vmem>>, vector<1x128xf32>
    %cst_62 = arith.constant dense<0xFF800000> : vector<1xf32>
    %158 = vector.multi_reduction <maximumf>, %157, %cst_62 [1] : vector<1x128xf32> to vector<1xf32>
    %159 = vector.shape_cast %158 : vector<1xf32> to vector<1x1xf32>
    %160 = vector.broadcast %159 : vector<1x1xf32> to vector<1x128xf32>
    %161 = arith.cmpf oeq, %157, %160 : vector<1x128xf32>
    %c128_i32_63 = arith.constant 128 : i32
    %162 = vector.broadcast %c128_i32_63 : i32 to vector<1x128xi32>
    %163 = arith.select %161, %26, %162 : vector<1x128xi1>, vector<1x128xi32>
    %164 = vector.shape_cast %163 : vector<1x128xi32> to vector<1x1x128xi32>
    %cst_64 = arith.constant dense<2147483647> : vector<1xi32>
    %165 = vector.multi_reduction <minsi>, %164, %cst_64 [1, 2] : vector<1x1x128xi32> to vector<1xi32>
    %166 = vector.shape_cast %165 : vector<1xi32> to vector<1x1x1xi32>
    %167 = vector.extract %166[0, 0, 0] : i32 from vector<1x1x1xi32>
    %168 = arith.index_cast %c7_i32 : i32 to index
    %c0_65 = arith.constant 0 : index
    %169 = vector.load %arg8[%168, %c0_65] : memref<8x128xf32, #tpu.memory_space<vmem>>, vector<1x128xf32>
    tpu.vector_store %arg8[%168, %c0_65], %157 {strides = array<i32>} : memref<8x128xf32, #tpu.memory_space<vmem>>, vector<1x128xf32>,
    %170 = arith.index_cast %c7_i32 : i32 to index
    %171 = memref.load %arg9[%170] : memref<8xi32, #tpu.memory_space<smem>>
    memref.store %167, %arg9[%170] : memref<8xi32, #tpu.memory_space<smem>>
    %c8_i32 = arith.constant 8 : i32
    %c0_66 = arith.constant 0 : index
    %c0_67 = arith.constant 0 : index
    %172 = vector.load %arg8[%c0_66, %c0_67] : memref<8x128xf32, #tpu.memory_space<vmem>>, vector<8x128xf32>
    %cst_68 = arith.constant dense<0xFF800000> : vector<8xf32>
    %173 = vector.multi_reduction <maximumf>, %172, %cst_68 [1] : vector<8x128xf32> to vector<8xf32>
    %174 = vector.shape_cast %173 : vector<8xf32> to vector<8x1xf32>
    %175 = vector.broadcast %174 : vector<8x1xf32> to vector<8x128xf32>
    %176 = arith.subf %172, %175 : vector<8x128xf32>
    %177 = math.exp %176 : vector<8x128xf32>
    %cst_69 = arith.constant dense<0.000000e+00> : vector<8xf32>
    %178 = vector.multi_reduction <add>, %177, %cst_69 [1] : vector<8x128xf32> to vector<8xf32>
    %179 = vector.shape_cast %178 : vector<8xf32> to vector<8x1xf32>
    %180 = math.log %179 : vector<8x1xf32>
    %181 = vector.broadcast %180 : vector<8x1xf32> to vector<8x128xf32>
    %182 = arith.subf %176, %181 : vector<8x128xf32>
    %c0_70 = arith.constant 0 : index
    %c0_71 = arith.constant 0 : index
    %183 = vector.load %arg8[%c0_70, %c0_71] : memref<8x128xf32, #tpu.memory_space<vmem>>, vector<8x128xf32>
    tpu.vector_store %arg8[%c0_70, %c0_71], %182 {strides = array<i32>} : memref<8x128xf32, #tpu.memory_space<vmem>>, vector<8x128xf32>,
    return
  }
}

</mosaic_0001>

<bundles_post_ra>
// kernel: tpu_custom_call.1
= control target key start
LH: loop header
LB: loop body
LE: loop exit
PB: predicated region body
PF: predicated region fallthrough
CT: control target
= control target key end

     0   :  { %16 = vsyncpa [#allocation5], 0  ;;  %s1150_s0 = inlined_call_operand.<no memory space> [shape: s32[1], index: 0, kind: input, shape index: {}]   ;;  %s1151_s1 = inlined_call_operand.hbm [shape: f32[8,256], index: 1, kind: input, shape index: {}]   ;;  %s1152_s2 = inlined_call_operand.hbm [shape: f32[16,16], index: 2, kind: input, shape index: {}]   ;;  %s1153_s3 = inlined_call_operand.hbm [shape: f32[256,128], index: 3, kind: input, shape index: {}]   ;;  %s1154_s4 = inlined_call_operand.hbm [shape: f32[16,128], index: 4, kind: input, shape index: {}]   ;;  %s1155_s5 = inlined_call_operand.vmem [shape: f32[1,128], index: 5, kind: input, shape index: {}]   ;;  %s1156_s6 = inlined_call_operand.hbm [shape: f32[128,128], index: 6, kind: input, shape index: {}]   ;;  %s1157_s7 = inlined_call_operand.vmem [shape: f32[1,128], index: 7, kind: input, shape index: {}]   ;;  %s1158_s8 = inlined_call_operand.hbm [shape: f32[8,128], index: 8, kind: output, shape index: {0}]   ;;  %s1159_s9 = inlined_call_operand.hbm [shape: s32[8], index: 9, kind: output, shape index: {1}]  }
   0x1   :  { %17 = vsyncpa [#allocation9], 0 }
   0x2   :  { %18 = vsyncpa [#allocation12], 0 }
   0x3   :  { %19 = vsyncpa [#allocation6], 0  ;;  %s38_s11 = sshll.u32 %s1152_s2, 4  ;;  %s39_s11 = int_to_ptr.hbm [resolvable:$true] %s38_s11 }
   0x4   :  { %20 = vsyncpa [#allocation7], 0  ;;  %s1001_s12 = smov [#allocation8]   ;;  %s64_s16 = sshll.u32 %s1154_s4, 4  ;;  %s65_s16 = int_to_ptr.hbm [resolvable:$true] %s64_s16 }
   0x5   :  { %s40_s13 = sshll.u32 %s1001_s12, 4  ;;  %s1002_s17 = smov 128   ;;  %s41_s13 = int_to_ptr.vmem [resolvable:$true] %s40_s13 }
   0x6   :  { %s1003_s18 = smov 8   ;;  %s1004_s19 = smov [#allocation11]  }
   0x7   :  { %46 = dma.hbm_to_vmem [thread:$0]  %s39_s11, 256, %s41_s13, [#allocation9], %s1002_s17, %s1002_s17, %s1003_s18  }
   0x8   :  { %s66_s20 = sshll.u32 %s1004_s19, 4  ;;  %s28_s23 = sshll.u32 %s1151_s1, 4  ;;  %s67_s20 = int_to_ptr.vmem [resolvable:$true] %s66_s20  ;;  %s29_s23 = int_to_ptr.hbm [resolvable:$true] %s28_s23 }
   0x9   :  { %72 = dma.hbm_to_vmem [thread:$0]  %s65_s16, 256, %s67_s20, [#allocation12], %s1002_s17, %s1002_s17, %s1003_s18  }
   0xa   :  { %s51_s25 = sshll.u32 %s1153_s3, 4  ;;  %s1005_s26 = smov [#allocation4]   ;;  %s52_s25 = int_to_ptr.hbm [resolvable:$true] %s51_s25 }
   0xb   :  { %s30_s27 = sshll.u32 %s1005_s26, 4  ;;  %s1006_s4 = smov [#allocation10]   ;;  %s31_s27 = int_to_ptr.vmem [resolvable:$true] %s30_s27 }
   0xc   :  { %33 = dma.hbm_to_vmem [thread:$0]  %s29_s23, 256, %s31_s27, [#allocation5]  }
   0xd   :  { %s53_s28 = sshll.u32 %s1006_s4, 4  ;;  %s79_s10 = sshll.u32 %s1156_s6, 4  ;;  %s54_s28 = int_to_ptr.vmem [resolvable:$true] %s53_s28  ;;  %s80_s10 = int_to_ptr.hbm [resolvable:$true] %s79_s10 }
   0xe   :  { %59 = dma.hbm_to_vmem [thread:$0]  %s52_s25, 4096, %s54_s28, [#allocation9], %s1002_s17, %s1002_s17, %s1003_s18  }
   0xf   :  { %s1007_s1 = smov [#allocation13]  }
  0x10   :  { %s81_s11 = sshll.u32 %s1007_s1, 4  ;;  %s82_s11 = int_to_ptr.vmem [resolvable:$true] %s81_s11 }
  0x11   :  { %87 = dma.hbm_to_vmem [thread:$0]  %s80_s10, 2048, %s82_s11, [#allocation12], %s1002_s17, %s1002_s17, %s1003_s18  }
  0x12   :  { %991 = dma.done.wait [#allocation5], 256  }
  0x13   :  { %992 = vsyncadd [#allocation5], 4294967040 }
  0x14   :  { %993 = dma.done.wait [#allocation9], 4352  }
  0x15   :  { %994 = vsyncadd [#allocation9], 4294962944 }
  0x16   :  { %995 = dma.done.wait [#allocation12], 2304  }
  0x17   :  { %996 = vsyncadd [#allocation12], 4294964992  ;;  %v127_v0 = vld [vmem:[#allocation10 + $0x78] sm:$0xff]  ;;  %v126_v1 = vld [vmem:[#allocation10 + $0x70] sm:$0xff]  ;;  %vm192_vm0 = vcmask 130048   ;;  %s414_s14 = scalar_lea.vmem [#allocation2], %s1150_s0 }
  0x18   :  { %148 = vmatpush.msra.mxu1 %v127_v0  ;;  %v125_v2 = vld [vmem:[#allocation10 + $0x68] sm:$0xff]  ;;  %v124_v3 = vld [vmem:[#allocation10 + $0x60] sm:$0xff]  ;;  %v123_v4 = vld [vmem:[#allocation10 + $0x58] sm:$0xff]  ;;  %s721_s28 = sshll.u32 %s1158_s8, 4  ;;  %s1008_s29 = smov [#allocation14]   ;;  %s722_s28 = int_to_ptr.hbm [resolvable:$true] %s721_s28 }
  0x19   :  { %v122_v5 = vld [vmem:[#allocation10 + $0x50] sm:$0xff]  ;;  %v121_v6 = vld [vmem:[#allocation10 + $0x48] sm:$0xff]  ;;  %v120_v7 = vld [vmem:[#allocation10 + $0x40] sm:$0xff]  ;;  %s719_s30 = sshll.u32 %s1008_s29, 4  ;;  %s730_s1 = sshll.u32 %s1159_s9, 4  ;;  %s720_s30 = int_to_ptr.vmem [resolvable:$true] %s719_s30  ;;  %s731_s1 = int_to_ptr.hbm [resolvable:$true] %s730_s1 }
  0x1a   :  { %149 = vmatpush.msra.mxu1 %v126_v1  ;;  %v119_v8 = vld [vmem:[#allocation10 + $0x38] sm:$0xff]  ;;  %v118_v9 = vld [vmem:[#allocation10 + $0x30] sm:$0xff]  ;;  %v191_v10 = vld [vmem:[#allocation11 + $0x8] sm:$0xff]  ;;  %s1009_s3 = smov [#allocation15]  }
  0x1b   :  { %v117_v11 = vld [vmem:[#allocation10 + $0x28] sm:$0xff]  ;;  %213 = vmatpush.msra.mxu2 %v191_v10  ;;  %v190_v12 = vld [vmem:[#allocation11] sm:$0xff]  ;;  %v188_v14 = vld [vmem:[#allocation8] sm:$0xff] }
  0x1c   :  { %150 = vmatpush.msra.mxu1 %v125_v2  ;;  %v116_v13 = vld [vmem:[#allocation10 + $0x20] sm:$0xff]  ;;  %v115_v15 = vld [vmem:[#allocation10 + $0x18] sm:$0xff]  ;;  %v114_v16 = vld [vmem:[#allocation10 + $0x10] sm:$0xff] }
  0x1d   :  { %214 = vmatpush.msra.mxu2 %v190_v12  ;;  %v113_v17 = vld [vmem:[#allocation10 + $0x8] sm:$0xff]  ;;  %v112_v18 = vld [vmem:[#allocation10] sm:$0xff]  ;;  %v189_v19 = vld [vmem:[#allocation8 + $0x8] sm:$0xff] }
  0x1e   :  { %151 = vmatpush.msra.mxu1 %v124_v3  ;;  %763 = vmatmul.msk.f32.vlgmr.msra.gmra.mxu2 %vm192_vm0, %v188_v14  ;;  %v143_v20 = vld [vmem:[#allocation10 + $0xf8] sm:$0xff]  ;;  %v110_v21 = vld [vmem:[#allocation4] sm:$0xff]  ;;  %v142_v22 = vld [vmem:[#allocation10 + $0xf0] sm:$0xff] }
  0x1f   :  { %v325_v23 = vld [vmem:[#allocation13 + $0x78] sm:$0xff]  ;;  %v324_v24 = vld [vmem:[#allocation13 + $0x70] sm:$0xff]  ;;  %v323_v26 = vld [vmem:[#allocation13 + $0x68] sm:$0xff] }
  0x20   :  { %152 = vmatpush.msra.mxu1 %v123_v4  ;;  %330 = vmatpush.msra.mxu0 %v325_v23  ;;  %v141_v25 = vld [vmem:[#allocation10 + $0xe8] sm:$0xff]  ;;  %v140_v27 = vld [vmem:[#allocation10 + $0xe0] sm:$0xff]  ;;  %v322_v28 = vld [vmem:[#allocation13 + $0x60] sm:$0xff] }
  0x21   :  { %772 = vmatpush.msrb.mxu2 %v325_v23  ;;  %773 = vmatpush.msra.mxu3 %v325_v23  ;;  %v139_v29 = vld [vmem:[#allocation10 + $0xd8] sm:$0xff]  ;;  %v321_v30 = vld [vmem:[#allocation13 + $0x58] sm:$0xff]  ;;  %v138_v31 = vld [vmem:[#allocation10 + $0xd0] sm:$0xff] }
  0x22   :  { %153 = vmatpush.msra.mxu1 %v122_v5  ;;  %331 = vmatpush.msra.mxu0 %v324_v24  ;;  %v320_v32 = vld [vmem:[#allocation13 + $0x50] sm:$0xff]  ;;  %v137_v33 = vld [vmem:[#allocation10 + $0xc8] sm:$0xff]  ;;  %v319_v34 = vld [vmem:[#allocation13 + $0x48] sm:$0xff] }
  0x23   :  { %774 = vmatpush.msrb.mxu2 %v324_v24  ;;  %775 = vmatpush.msra.mxu3 %v324_v24  ;;  %v136_v35 = vld [vmem:[#allocation10 + $0xc0] sm:$0xff]  ;;  %v135_v36 = vld [vmem:[#allocation10 + $0xb8] sm:$0xff]  ;;  %v134_v37 = vld [vmem:[#allocation10 + $0xb0] sm:$0xff] }
  0x24   :  { %154 = vmatpush.msra.mxu1 %v121_v6  ;;  %332 = vmatpush.msra.mxu0 %v323_v26  ;;  %v133_v38 = vld [vmem:[#allocation10 + $0xa8] sm:$0xff]  ;;  %v132_v39 = vld [vmem:[#allocation10 + $0xa0] sm:$0xff]  ;;  %v131_v40 = vld [vmem:[#allocation10 + $0x98] sm:$0xff] }
  0x25   :  { %776 = vmatpush.msrb.mxu2 %v323_v26  ;;  %777 = vmatpush.msra.mxu3 %v323_v26  ;;  %v130_v41 = vld [vmem:[#allocation10 + $0x90] sm:$0xff]  ;;  %v129_v42 = vld [vmem:[#allocation10 + $0x88] sm:$0xff]  ;;  %v128_v43 = vld [vmem:[#allocation10 + $0x80] sm:$0xff] }
  0x26   :  { %155 = vmatpush.msra.mxu1 %v120_v7  ;;  %764 = vmatmul.msk.f32.gmra.mxu2 %vm192_vm0, %v189_v19  ;;  %v111_v44 = vld [vmem:[#allocation4 + $0x8] sm:$0xff]  ;;  %v318_v45 = vld [vmem:[#allocation13 + $0x40] sm:$0xff]  ;;  %v316_v47 = vld [vmem:[#allocation13 + $0x30] sm:$0xff] }
  0x27   :  { %333 = vmatpush.msra.mxu0 %v322_v28  ;;  %778 = vmatpush.msrb.mxu2 %v322_v28  ;;  %v317_v46 = vld [vmem:[#allocation13 + $0x38] sm:$0xff]  ;;  %v315_v48 = vld [vmem:[#allocation13 + $0x28] sm:$0xff]  ;;  %v314_v49 = vld [vmem:[#allocation13 + $0x20] sm:$0xff] }
  0x28   :  { %156 = vmatpush.msra.mxu1 %v119_v8  ;;  %779 = vmatpush.msra.mxu3 %v322_v28  ;;  %v313_v50 = vld [vmem:[#allocation13 + $0x18] sm:$0xff]  ;;  %v312_v51 = vld [vmem:[#allocation13 + $0x10] sm:$0xff]  ;;  %v311_v52 = vld [vmem:[#allocation13 + $0x8] sm:$0xff] }
  0x29   :  { %334 = vmatpush.msra.mxu0 %v321_v30  ;;  %780 = vmatpush.msrb.mxu2 %v321_v30  ;;  %v310_v53 = vld [vmem:[#allocation13] sm:$0xff]  ;;  %v829_v55 = vld [vmem:[%s1155_s5] ss:$0 sm:$0xff] }
  0x2a   :  { %157 = vmatpush.msra.mxu1 %v118_v9  ;;  %781 = vmatpush.msra.mxu3 %v321_v30 }
  0x2b   :  { %335 = vmatpush.msra.mxu0 %v320_v32  ;;  %782 = vmatpush.msrb.mxu2 %v320_v32 }
  0x2c   :  { %158 = vmatpush.msra.mxu1 %v117_v11  ;;  %783 = vmatpush.msra.mxu3 %v320_v32 }
  0x2d   :  { %336 = vmatpush.msra.mxu0 %v319_v34  ;;  %784 = vmatpush.msrb.mxu2 %v319_v34 }
  0x2e   :  { %159 = vmatpush.msra.mxu1 %v116_v13  ;;  %785 = vmatpush.msra.mxu3 %v319_v34 }
  0x2f   :  { %337 = vmatpush.msra.mxu0 %v318_v45  ;;  %786 = vmatpush.msrb.mxu2 %v318_v45 }
  0x30   :  { %160 = vmatpush.msra.mxu1 %v115_v15  ;;  %787 = vmatpush.msra.mxu3 %v318_v45 }
  0x31   :  { %338 = vmatpush.msra.mxu0 %v317_v46  ;;  %788 = vmatpush.msrb.mxu2 %v317_v46 }
  0x32   :  { %161 = vmatpush.msra.mxu1 %v114_v16  ;;  %789 = vmatpush.msra.mxu3 %v317_v46 }
  0x33   :  { %339 = vmatpush.msra.mxu0 %v316_v47  ;;  %790 = vmatpush.msrb.mxu2 %v316_v47 }
  0x34   :  { %162 = vmatpush.msra.mxu1 %v113_v17  ;;  %791 = vmatpush.msra.mxu3 %v316_v47 }
  0x35   :  { %340 = vmatpush.msra.mxu0 %v315_v48  ;;  %792 = vmatpush.msrb.mxu2 %v315_v48 }
  0x36   :  { %163 = vmatpush.msra.mxu1 %v112_v18  ;;  %793 = vmatpush.msra.mxu3 %v315_v48 }
  0x37   :  { %164 = vmatmul.f32.vlgmr.msra.gmra.mxu1 %v110_v21  ;;  %341 = vmatpush.msra.mxu0 %v314_v49 }
  0x38   :  { %168 = vmatpush.msrb.mxu1 %v143_v20  ;;  %794 = vmatpush.msrb.mxu2 %v314_v49 }
  0x39   :  { %795 = vmatpush.msra.mxu3 %v314_v49  ;;  %342 = vmatpush.msra.mxu0 %v313_v50 }
  0x3a   :  { %169 = vmatpush.msrb.mxu1 %v142_v22  ;;  %796 = vmatpush.msrb.mxu2 %v313_v50 }
  0x3b   :  { %797 = vmatpush.msra.mxu3 %v313_v50  ;;  %343 = vmatpush.msra.mxu0 %v312_v51 }
  0x3c   :  { %170 = vmatpush.msrb.mxu1 %v141_v25  ;;  %798 = vmatpush.msrb.mxu2 %v312_v51 }
  0x3d   :  { %799 = vmatpush.msra.mxu3 %v312_v51  ;;  %344 = vmatpush.msra.mxu0 %v311_v52 }
  0x3e   :  { %171 = vmatpush.msrb.mxu1 %v140_v27  ;;  %800 = vmatpush.msrb.mxu2 %v311_v52 }
  0x3f   :  { %801 = vmatpush.msra.mxu3 %v311_v52  ;;  %345 = vmatpush.msra.mxu0 %v310_v53 }
  0x40   :  { %172 = vmatpush.msrb.mxu1 %v139_v29  ;;  %802 = vmatpush.msrb.mxu2 %v310_v53 }
  0x41   :  { %803 = vmatpush.msra.mxu3 %v310_v53 }
  0x42   :  { %173 = vmatpush.msrb.mxu1 %v138_v31 }
  0x44   :  { %174 = vmatpush.msrb.mxu1 %v137_v33 }
  0x46   :  { %175 = vmatpush.msrb.mxu1 %v136_v35 }
  0x48   :  { %176 = vmatpush.msrb.mxu1 %v135_v36 }
  0x4a   :  { %177 = vmatpush.msrb.mxu1 %v134_v37 }
  0x4c   :  { %178 = vmatpush.msrb.mxu1 %v133_v38 }
  0x4e   :  { %179 = vmatpush.msrb.mxu1 %v132_v39 }
  0x50   :  { %180 = vmatpush.msrb.mxu1 %v131_v40 }
  0x52   :  { %181 = vmatpush.msrb.mxu1 %v130_v41 }
  0x54   :  { %182 = vmatpush.msrb.mxu1 %v129_v42 }
  0x56   :  { %183 = vmatpush.msrb.mxu1 %v128_v43 }
  0x57   :  { %184 = vmatmul.f32.vlgmr.msrb.gmra.mxu1 %v111_v44 }
  0xa1   :  { %v1078_v56 = vpop.f32.mrf.mxu2 }
  0xa9   :  { %v1086_v0 = vpop.f32.mrf.mxu2 }
  0xb4   :  { %v165_v54 = vpop.f32.mrf.mxu1 }
  0xb5   :  { %v166_v57 = vadd.f32 %v829_v55, %v165_v54 }
  0xd4   :  { %v185_v58 = vpop.f32.mrf.mxu1 }
  0xd5   :  { %v1080_v59 = vadd.f32 %v185_v58, %v166_v57 }
  0xd7   :  { %v230_v60 = vperm.slane %v1080_v59, 0  ;;  %v225_v61 = vrot.slane %v1080_v59, 3  ;;  %v227_v62 = vrot.slane %v1080_v59, 5  ;;  %v228_v63 = vrot.slane %v1080_v59, 6 }
  0xd8   :  { %v223_v9 = vrot.slane %v1080_v59, 1  ;;  %v226_v15 = vrot.slane %v1080_v59, 4  ;;  %v229_v29 = vrot.slane %v1080_v59, 7  ;;  %v224_v36 = vrot.slane %v1080_v59, 2 }
  0xd9   :  { %v246_v1 = vadd.f32 %v230_v60, %v1078_v56  ;;  %v233_v2 = vperm.slane %v225_v61, 0  ;;  %v1089_v3 = vperm.slane %v227_v62, 0  ;;  %v247_v7 = vadd.f32 %v230_v60, %v1086_v0  ;;  %v830_v60 = vld [vmem:[%s1157_s7] ss:$0 sm:$0xff] }
  0xda   :  { %v236_v8 = vperm.slane %v228_v63, 0  ;;  %v231_v19 = vperm.slane %v223_v9, 0  ;;  %v234_v21 = vperm.slane %v226_v15, 0  ;;  %v237_v33 = vperm.slane %v229_v29, 0 }
  0xdb   :  { %vm262_vm1 = vcmp.gt.f32.partialorder %v246_v1, 0.0  ;;  %v278_v4 = vmul.f32 0.01, %v246_v1  ;;  %v252_v5 = vadd.f32 %v233_v2, %v1078_v56  ;;  %v257_v6 = vadd.f32 %v1089_v3, %v1086_v0 }
  0xdc   :  { %v253_v14 = vadd.f32 %v233_v2, %v1086_v0  ;;  %v258_v17 = vadd.f32 %v236_v8, %v1078_v56  ;;  %v279_v18 = vmul.f32 0.01, %v247_v7  ;;  %vm263_vm4 = vcmp.gt.f32.partialorder %v247_v7, 0.0 }
  0xdd   :  { %v294_v10 = vsel %vm262_vm1, %v246_v1, %v278_v4  ;;  %vm268_vm2 = vcmp.gt.f32.partialorder %v252_v5, 0.0  ;;  %v284_v11 = vmul.f32 0.01, %v252_v5  ;;  %vm273_vm3 = vcmp.gt.f32.partialorder %v257_v6, 0.0 }
  0xde   :  { %346 = vmatmul.f32.vlgmr.msra.gmra.mxu0 %v294_v10  ;;  %v289_v12 = vmul.f32 0.01, %v257_v6  ;;  %v285_v20 = vmul.f32 0.01, %v253_v14  ;;  %vm269_vm5 = vcmp.gt.f32.partialorder %v253_v14, 0.0  ;;  %v295_v23 = vsel %vm263_vm4, %v247_v7, %v279_v18 }
  0xdf   :  { %v300_v13 = vsel %vm268_vm2, %v252_v5, %v284_v11  ;;  %v290_v22 = vmul.f32 0.01, %v258_v17  ;;  %vm274_vm6 = vcmp.gt.f32.partialorder %v258_v17, 0.0  ;;  %v248_v24 = vadd.f32 %v231_v19, %v1078_v56 }
  0xe0   :  { %364 = vmatmul.f32.vlgmr.msrb.gmra.mxu2 %v300_v13  ;;  %v305_v16 = vsel %vm273_vm3, %v257_v6, %v289_v12  ;;  %v301_v25 = vsel %vm269_vm5, %v253_v14, %v285_v20  ;;  %v254_v26 = vadd.f32 %v234_v21, %v1078_v56  ;;  %v259_v28 = vadd.f32 %v236_v8, %v1086_v0 }
  0xe1   :  { %379 = vmatmul.f32.vlgmr.msra.gmra.mxu3 %v305_v16  ;;  %v306_v27 = vsel %vm274_vm6, %v258_v17, %v290_v22  ;;  %v280_v30 = vmul.f32 0.01, %v248_v24  ;;  %vm264_vm7 = vcmp.gt.f32.partialorder %v248_v24, 0.0  ;;  %v249_v35 = vadd.f32 %v231_v19, %v1086_v0 }
  0xe2   :  { %v286_v31 = vmul.f32 0.01, %v254_v26  ;;  %vm270_vm8 = vcmp.gt.f32.partialorder %v254_v26, 0.0  ;;  %v291_v32 = vmul.f32 0.01, %v259_v28  ;;  %vm275_vm9 = vcmp.gt.f32.partialorder %v259_v28, 0.0 }
  0xe3   :  { %v296_v34 = vsel %vm264_vm7, %v248_v24, %v280_v30  ;;  %v255_v38 = vadd.f32 %v234_v21, %v1086_v0  ;;  %v260_v40 = vadd.f32 %v237_v33, %v1078_v56  ;;  %v281_v41 = vmul.f32 0.01, %v249_v35 }
  0xe4   :  { %v302_v37 = vsel %vm270_vm8, %v254_v26, %v286_v31  ;;  %v307_v39 = vsel %vm275_vm9, %v259_v28, %v291_v32  ;;  %v232_v42 = vperm.slane %v224_v36, 0  ;;  %vm265_vm10 = vcmp.gt.f32.partialorder %v249_v35, 0.0 }
  0xe5   :  { %v287_v43 = vmul.f32 0.01, %v255_v38  ;;  %vm271_vm11 = vcmp.gt.f32.partialorder %v255_v38, 0.0  ;;  %v292_v44 = vmul.f32 0.01, %v260_v40  ;;  %v297_v45 = vsel %vm265_vm10, %v249_v35, %v281_v41 }
  0xe6   :  { %349 = vmatmul.f32.gmra.mxu0 %v295_v23  ;;  %vm276_vm12 = vcmp.gt.f32.partialorder %v260_v40, 0.0  ;;  %v250_v46 = vadd.f32 %v232_v42, %v1078_v56  ;;  %v256_v48 = vadd.f32 %v1089_v3, %v1078_v56  ;;  %v261_v50 = vadd.f32 %v237_v33, %v1086_v0 }
  0xe7   :  { %v303_v47 = vsel %vm271_vm11, %v255_v38, %v287_v43  ;;  %v308_v49 = vsel %vm276_vm12, %v260_v40, %v292_v44  ;;  %v251_v55 = vadd.f32 %v232_v42, %v1086_v0  ;;  %vm416_vm1 = vcmask 1040384  }
  0xe8   :  { %367 = vmatmul.f32.gmra.mxu2 %v301_v25  ;;  %v282_v51 = vmul.f32 0.01, %v250_v46  ;;  %vm266_vm13 = vcmp.gt.f32.partialorder %v250_v46, 0.0  ;;  %v288_v52 = vmul.f32 0.01, %v256_v48  ;;  %vm272_vm14 = vcmp.gt.f32.partialorder %v256_v48, 0.0 }
  0xe9   :  { %382 = vmatmul.f32.gmra.mxu3 %v306_v27  ;;  %v293_v53 = vmul.f32 0.01, %v261_v50  ;;  %vm277_vm15 = vcmp.gt.f32.partialorder %v261_v50, 0.0  ;;  %v283_v56 = vmul.f32 0.01, %v251_v55  ;;  %vm267_vm0 = vcmp.gt.f32.partialorder %v251_v55, 0.0 }
  0xea   :  { %v298_v54 = vsel %vm266_vm13, %v250_v46, %v282_v51  ;;  %v304_v57 = vsel %vm272_vm14, %v256_v48, %v288_v52  ;;  %v411_v31 = vlaneseq }
  0xeb   :  { %v309_v58 = vsel %vm277_vm15, %v261_v50, %v293_v53  ;;  %v299_v59 = vsel %vm267_vm0, %v251_v55, %v283_v56 }
  0xec   :  { %v1119_v32 = vand.u32 127, %v411_v31 }
  0xee   :  { %352 = vmatmul.f32.gmra.mxu0 %v296_v34 }
  0xf0   :  { %370 = vmatmul.f32.gmra.mxu2 %v302_v37 }
  0xf1   :  { %385 = vmatmul.f32.gmra.mxu3 %v307_v39 }
  0xf6   :  { %355 = vmatmul.f32.gmra.mxu0 %v297_v45 }
  0xf8   :  { %373 = vmatmul.f32.gmra.mxu2 %v303_v47 }
  0xf9   :  { %388 = vmatmul.f32.gmra.mxu3 %v308_v49 }
  0xfe   :  { %358 = vmatmul.f32.gmra.mxu0 %v298_v54 }
 0x100   :  { %376 = vmatmul.f32.gmra.mxu2 %v304_v57 }
 0x101   :  { %391 = vmatmul.f32.gmra.mxu3 %v309_v58 }
 0x106   :  { %361 = vmatmul.f32.gmra.mxu0 %v299_v59 }
 0x15b   :  { %v347_v61 = vpop.f32.mrf.mxu0 }
 0x15c   :  { %v348_v62 = vadd.f32 %v830_v60, %v347_v61 }
 0x15e   :  { %395 = vst [vmem:[#allocation2] sm:$0xff] %v348_v62 }
 0x163   :  { %v350_v63 = vpop.f32.mrf.mxu0  ;;  %v365_v1 = vpop.f32.mrf.mxu2 }
 0x164   :  { %v351_v2 = vadd.f32 %v830_v60, %v350_v63  ;;  %v366_v0 = vadd.f32 %v830_v60, %v365_v1  ;;  %v380_v3 = vpop.f32.mrf.mxu3 }
 0x165   :  { %v381_v4 = vadd.f32 %v830_v60, %v380_v3 }
 0x166   :  { %396 = vst [vmem:[#allocation2 + $0x8] sm:$0xff] %v351_v2 }
 0x167   :  { %401 = vst [vmem:[#allocation2 + $0x30] sm:$0xff] %v366_v0 }
 0x168   :  { %406 = vst [vmem:[#allocation2 + $0x58] sm:$0xff] %v381_v4 }
 0x16b   :  { %v353_v5 = vpop.f32.mrf.mxu0  ;;  %v368_v6 = vpop.f32.mrf.mxu2 }
 0x16c   :  { %v354_v7 = vadd.f32 %v830_v60, %v353_v5  ;;  %v369_v8 = vadd.f32 %v830_v60, %v368_v6  ;;  %v383_v9 = vpop.f32.mrf.mxu3 }
 0x16d   :  { %v384_v10 = vadd.f32 %v830_v60, %v383_v9 }
 0x16e   :  { %397 = vst [vmem:[#allocation2 + $0x10] sm:$0xff] %v354_v7 }
 0x16f   :  { %402 = vst [vmem:[#allocation2 + $0x38] sm:$0xff] %v369_v8 }
 0x170   :  { %407 = vst [vmem:[#allocation2 + $0x60] sm:$0xff] %v384_v10 }
 0x173   :  { %v356_v11 = vpop.f32.mrf.mxu0  ;;  %v371_v12 = vpop.f32.mrf.mxu2 }
 0x174   :  { %v357_v13 = vadd.f32 %v830_v60, %v356_v11  ;;  %v372_v14 = vadd.f32 %v830_v60, %v371_v12  ;;  %v386_v15 = vpop.f32.mrf.mxu3 }
 0x175   :  { %v387_v16 = vadd.f32 %v830_v60, %v386_v15 }
 0x176   :  { %398 = vst [vmem:[#allocation2 + $0x18] sm:$0xff] %v357_v13 }
 0x177   :  { %403 = vst [vmem:[#allocation2 + $0x40] sm:$0xff] %v372_v14 }
 0x178   :  { %408 = vst [vmem:[#allocation2 + $0x68] sm:$0xff] %v387_v16 }
 0x17b   :  { %v359_v17 = vpop.f32.mrf.mxu0  ;;  %v374_v18 = vpop.f32.mrf.mxu2 }
 0x17c   :  { %v360_v19 = vadd.f32 %v830_v60, %v359_v17  ;;  %v375_v20 = vadd.f32 %v830_v60, %v374_v18  ;;  %v389_v21 = vpop.f32.mrf.mxu3 }
 0x17d   :  { %v390_v22 = vadd.f32 %v830_v60, %v389_v21 }
 0x17e   :  { %399 = vst [vmem:[#allocation2 + $0x20] sm:$0xff] %v360_v19 }
 0x17f   :  { %404 = vst [vmem:[#allocation2 + $0x48] sm:$0xff] %v375_v20 }
 0x180   :  { %409 = vst [vmem:[#allocation2 + $0x70] sm:$0xff] %v390_v22 }
 0x183   :  { %v362_v23 = vpop.f32.mrf.mxu0  ;;  %v377_v24 = vpop.f32.mrf.mxu2 }
 0x184   :  { %v363_v25 = vadd.f32 %v830_v60, %v362_v23  ;;  %v378_v26 = vadd.f32 %v830_v60, %v377_v24  ;;  %v392_v27 = vpop.f32.mrf.mxu3 }
 0x185   :  { %v393_v28 = vadd.f32 %v830_v60, %v392_v27 }
 0x186   :  { %400 = vst [vmem:[#allocation2 + $0x28] sm:$0xff] %v363_v25 }
 0x187   :  { %405 = vst [vmem:[#allocation2 + $0x50] sm:$0xff] %v378_v26 }
 0x188   :  { %410 = vst [vmem:[#allocation2 + $0x78] sm:$0xff] %v393_v28 }
 0x18f   :  { %v415_v29 = vld [vmem:[%s414_s14] sm:$0x1] }
 0x190   :  { %v417_v30 = vsel %vm416_vm1, %v415_v29, -inf  ;;  %447 = vst [vmem:[#allocation14] sm:$0x1] %v415_v29 }
 0x191   :  { %418 = vmax.xlane.f32.xlu0 %v417_v30 }
 0x204   :  { %v419_v33 = vpop.xlane.xlu0 %418 }
 0x205   :  { %vm420_vm2 = vcmp.eq.f32.partialorder %v415_v29, %v419_v33 }
 0x206   :  { %v421_v34 = vsel %vm420_vm2, %v1119_v32, 128 }
 0x207   :  { %v422_v35 = vsel %vm416_vm1, %v421_v34, 2147483647 }
 0x208   :  { %v424_v36 = vshra.s32 %v422_v35, 16  ;;  %v423_v38 = vand.u32 65535, %v422_v35 }
 0x20a   :  { %v426_v37 = vcvt.s32.f32 %v424_v36  ;;  %v425_v40 = vcvt.s32.f32 %v423_v38 }
 0x20c   :  { %427 = vmin.xlane.f32.xlu0 %v426_v37 }
 0x27f   :  { %v428_v39 = vpop.xlane.xlu0 %427 }
 0x280   :  { %vm429_vm3 = vcmp.eq.f32.partialorder %v426_v37, %v428_v39  ;;  %v434_v42 = vcvt.f32.s32 %v428_v39 }
 0x281   :  { %v430_v41 = vsel %vm429_vm3, %v425_v40, inf }
 0x282   :  { %431 = vmin.xlane.f32.xlu1 %v430_v41  ;;  %v435_v44 = vshll.u32 %v434_v42, 16 }
 0x2f5   :  { %v432_v43 = vpop.xlane.xlu1 %431 }
 0x2f6   :  { %v433_v45 = vcvt.f32.s32 %v432_v43 }
 0x2f8   :  { %v436_v46 = vadd.s32 %v435_v44, %v433_v45 }
 0x2fa   :  { %v437_v47 = vrot.slane %v436_v46, 4 }
 0x2fc   :  { %vm438_vm4 = vcmp.lt.s32.totalorder %v436_v46, %v437_v47 }
 0x2fd   :  { %v439_v48 = vsel %vm438_vm4, %v436_v46, %v437_v47 }
 0x2fe   :  { %v440_v49 = vrot.slane %v439_v48, 2 }
 0x300   :  { %vm441_vm5 = vcmp.lt.s32.totalorder %v439_v48, %v440_v49 }
 0x301   :  { %v442_v50 = vsel %vm441_vm5, %v439_v48, %v440_v49 }
 0x302   :  { %v443_v51 = vrot.slane %v442_v50, 1 }
 0x304   :  { %vm444_vm6 = vcmp.lt.s32.totalorder %v442_v50, %v443_v51 }
 0x305   :  { %v445_v52 = vsel %vm444_vm6, %v442_v50, %v443_v51 }
 0x306   :  { %804 = vpush %v445_v52 }
 0x337   :  { %s805_s0 = spop %804 }
 0x338   :  { %449 = sst [smem:[#allocation15]] %s805_s0  ;;  %s749_s15 = scalar_lea.vmem [#allocation2], %s805_s0 }
 0x339   :  { %v765_v53 = vld [vmem:[%s749_s15 + $0x10] sm:$0x1] }
 0x33a   :  { %v453_v54 = vsel %vm416_vm1, %v765_v53, -inf  ;;  %483 = vst [vmem:[#allocation14 + $0x1] sm:$0x1] %v765_v53 }
 0x33b   :  { %454 = vmax.xlane.f32.xlu1 %v453_v54 }
 0x3ae   :  { %v455_v55 = vpop.xlane.xlu1 %454 }
 0x3af   :  { %vm456_vm7 = vcmp.eq.f32.partialorder %v765_v53, %v455_v55 }
 0x3b0   :  { %v457_v57 = vsel %vm456_vm7, %v1119_v32, 128 }
 0x3b1   :  { %v458_v58 = vsel %vm416_vm1, %v457_v57, 2147483647 }
 0x3b2   :  { %v460_v56 = vshra.s32 %v458_v58, 16  ;;  %v459_v60 = vand.u32 65535, %v458_v58 }
 0x3b4   :  { %v462_v59 = vcvt.s32.f32 %v460_v56  ;;  %v461_v62 = vcvt.s32.f32 %v459_v60 }
 0x3b6   :  { %463 = vmin.xlane.f32.xlu2 %v462_v59 }
 0x429   :  { %v464_v61 = vpop.xlane.xlu2 %463 }
 0x42a   :  { %vm465_vm8 = vcmp.eq.f32.partialorder %v462_v59, %v464_v61  ;;  %v470_v1 = vcvt.f32.s32 %v464_v61 }
 0x42b   :  { %v466_v63 = vsel %vm465_vm8, %v461_v62, inf }
 0x42c   :  { %467 = vmin.xlane.f32.xlu2 %v466_v63  ;;  %v471_v0 = vshll.u32 %v470_v1, 16 }
 0x49f   :  { %v468_v2 = vpop.xlane.xlu2 %467 }
 0x4a0   :  { %v469_v3 = vcvt.f32.s32 %v468_v2 }
 0x4a2   :  { %v472_v4 = vadd.s32 %v471_v0, %v469_v3 }
 0x4a4   :  { %v473_v5 = vrot.slane %v472_v4, 4 }
 0x4a6   :  { %vm474_vm9 = vcmp.lt.s32.totalorder %v472_v4, %v473_v5 }
 0x4a7   :  { %v475_v6 = vsel %vm474_vm9, %v472_v4, %v473_v5 }
 0x4a8   :  { %v476_v7 = vrot.slane %v475_v6, 2 }
 0x4aa   :  { %vm477_vm10 = vcmp.lt.s32.totalorder %v475_v6, %v476_v7 }
 0x4ab   :  { %v478_v8 = vsel %vm477_vm10, %v475_v6, %v476_v7 }
 0x4ac   :  { %v479_v9 = vrot.slane %v478_v8, 1 }
 0x4ae   :  { %vm480_vm11 = vcmp.lt.s32.totalorder %v478_v8, %v479_v9 }
 0x4af   :  { %v481_v10 = vsel %vm480_vm11, %v478_v8, %v479_v9 }
 0x4b0   :  { %806 = vpush %v481_v10 }
 0x4e1   :  { %s807_s16 = spop %806 }
 0x4e2   :  { %485 = sst [smem:[#allocation15 + $0x1]] %s807_s16  ;;  %s751_s17 = scalar_lea.vmem [#allocation2], %s807_s16 }
 0x4e3   :  { %v766_v11 = vld [vmem:[%s751_s17 + $0x20] sm:$0x1] }
 0x4e4   :  { %v489_v12 = vsel %vm416_vm1, %v766_v11, -inf  ;;  %519 = vst [vmem:[#allocation14 + $0x2] sm:$0x1] %v766_v11 }
 0x4e5   :  { %490 = vmax.xlane.f32.xlu0 %v489_v12 }
 0x558   :  { %v491_v13 = vpop.xlane.xlu0 %490 }
 0x559   :  { %vm492_vm12 = vcmp.eq.f32.partialorder %v766_v11, %v491_v13 }
 0x55a   :  { %v493_v14 = vsel %vm492_vm12, %v1119_v32, 128 }
 0x55b   :  { %v494_v15 = vsel %vm416_vm1, %v493_v14, 2147483647 }
 0x55c   :  { %v496_v16 = vshra.s32 %v494_v15, 16  ;;  %v495_v18 = vand.u32 65535, %v494_v15 }
 0x55e   :  { %v498_v17 = vcvt.s32.f32 %v496_v16  ;;  %v497_v20 = vcvt.s32.f32 %v495_v18 }
 0x560   :  { %499 = vmin.xlane.f32.xlu1 %v498_v17 }
 0x5d3   :  { %v500_v19 = vpop.xlane.xlu1 %499 }
 0x5d4   :  { %vm501_vm13 = vcmp.eq.f32.partialorder %v498_v17, %v500_v19  ;;  %v506_v22 = vcvt.f32.s32 %v500_v19 }
 0x5d5   :  { %v502_v21 = vsel %vm501_vm13, %v497_v20, inf }
 0x5d6   :  { %503 = vmin.xlane.f32.xlu2 %v502_v21  ;;  %v507_v24 = vshll.u32 %v506_v22, 16 }
 0x649   :  { %v504_v23 = vpop.xlane.xlu2 %503 }
 0x64a   :  { %v505_v25 = vcvt.f32.s32 %v504_v23 }
 0x64c   :  { %v508_v26 = vadd.s32 %v507_v24, %v505_v25 }
 0x64e   :  { %v509_v27 = vrot.slane %v508_v26, 4 }
 0x650   :  { %vm510_vm14 = vcmp.lt.s32.totalorder %v508_v26, %v509_v27 }
 0x651   :  { %v511_v28 = vsel %vm510_vm14, %v508_v26, %v509_v27 }
 0x652   :  { %v512_v29 = vrot.slane %v511_v28, 2 }
 0x654   :  { %vm513_vm15 = vcmp.lt.s32.totalorder %v511_v28, %v512_v29 }
 0x655   :  { %v514_v30 = vsel %vm513_vm15, %v511_v28, %v512_v29 }
 0x656   :  { %v515_v31 = vrot.slane %v514_v30, 1 }
 0x658   :  { %vm516_vm0 = vcmp.lt.s32.totalorder %v514_v30, %v515_v31 }
 0x659   :  { %v517_v33 = vsel %vm516_vm0, %v514_v30, %v515_v31 }
 0x65a   :  { %808 = vpush %v517_v33 }
 0x68b   :  { %s809_s18 = spop %808 }
 0x68c   :  { %521 = sst [smem:[#allocation15 + $0x2]] %s809_s18  ;;  %s753_s19 = scalar_lea.vmem [#allocation2], %s809_s18 }
 0x68d   :  { %v767_v34 = vld [vmem:[%s753_s19 + $0x30] sm:$0x1] }
 0x68e   :  { %v525_v35 = vsel %vm416_vm1, %v767_v34, -inf  ;;  %555 = vst [vmem:[#allocation14 + $0x3] sm:$0x1] %v767_v34 }
 0x68f   :  { %526 = vmax.xlane.f32.xlu0 %v525_v35 }
 0x702   :  { %v527_v36 = vpop.xlane.xlu0 %526 }
 0x703   :  { %vm528_vm2 = vcmp.eq.f32.partialorder %v767_v34, %v527_v36 }
 0x704   :  { %v529_v37 = vsel %vm528_vm2, %v1119_v32, 128 }
 0x705   :  { %v530_v38 = vsel %vm416_vm1, %v529_v37, 2147483647 }
 0x706   :  { %v532_v39 = vshra.s32 %v530_v38, 16  ;;  %v531_v41 = vand.u32 65535, %v530_v38 }
 0x708   :  { %v534_v40 = vcvt.s32.f32 %v532_v39  ;;  %v533_v43 = vcvt.s32.f32 %v531_v41 }
 0x70a   :  { %535 = vmin.xlane.f32.xlu1 %v534_v40 }
 0x77d   :  { %v536_v42 = vpop.xlane.xlu1 %535 }
 0x77e   :  { %vm537_vm3 = vcmp.eq.f32.partialorder %v534_v40, %v536_v42  ;;  %v542_v45 = vcvt.f32.s32 %v536_v42 }
 0x77f   :  { %v538_v44 = vsel %vm537_vm3, %v533_v43, inf }
 0x780   :  { %539 = vmin.xlane.f32.xlu2 %v538_v44  ;;  %v543_v47 = vshll.u32 %v542_v45, 16 }
 0x7f3   :  { %v540_v46 = vpop.xlane.xlu2 %539 }
 0x7f4   :  { %v541_v48 = vcvt.f32.s32 %v540_v46 }
 0x7f6   :  { %v544_v49 = vadd.s32 %v543_v47, %v541_v48 }
 0x7f8   :  { %v545_v50 = vrot.slane %v544_v49, 4 }
 0x7fa   :  { %vm546_vm4 = vcmp.lt.s32.totalorder %v544_v49, %v545_v50 }
 0x7fb   :  { %v547_v51 = vsel %vm546_vm4, %v544_v49, %v545_v50 }
 0x7fc   :  { %v548_v52 = vrot.slane %v547_v51, 2 }
 0x7fe   :  { %vm549_vm5 = vcmp.lt.s32.totalorder %v547_v51, %v548_v52 }
 0x7ff   :  { %v550_v53 = vsel %vm549_vm5, %v547_v51, %v548_v52 }
 0x800   :  { %v551_v54 = vrot.slane %v550_v53, 1 }
 0x802   :  { %vm552_vm6 = vcmp.lt.s32.totalorder %v550_v53, %v551_v54 }
 0x803   :  { %v553_v55 = vsel %vm552_vm6, %v550_v53, %v551_v54 }
 0x804   :  { %810 = vpush %v553_v55 }
 0x835   :  { %s811_s20 = spop %810 }
 0x836   :  { %557 = sst [smem:[#allocation15 + $0x3]] %s811_s20  ;;  %s755_s21 = scalar_lea.vmem [#allocation2], %s811_s20 }
 0x837   :  { %v768_v57 = vld [vmem:[%s755_s21 + $0x40] sm:$0x1] }
 0x838   :  { %v561_v58 = vsel %vm416_vm1, %v768_v57, -inf  ;;  %591 = vst [vmem:[#allocation14 + $0x4] sm:$0x1] %v768_v57 }
 0x839   :  { %562 = vmax.xlane.f32.xlu0 %v561_v58 }
 0x8ac   :  { %v563_v56 = vpop.xlane.xlu0 %562 }
 0x8ad   :  { %vm564_vm7 = vcmp.eq.f32.partialorder %v768_v57, %v563_v56 }
 0x8ae   :  { %v565_v59 = vsel %vm564_vm7, %v1119_v32, 128 }
 0x8af   :  { %v566_v60 = vsel %vm416_vm1, %v565_v59, 2147483647 }
 0x8b0   :  { %v568_v61 = vshra.s32 %v566_v60, 16  ;;  %v567_v63 = vand.u32 65535, %v566_v60 }
 0x8b2   :  { %v570_v62 = vcvt.s32.f32 %v568_v61  ;;  %v569_v2 = vcvt.s32.f32 %v567_v63 }
 0x8b4   :  { %571 = vmin.xlane.f32.xlu1 %v570_v62 }
 0x927   :  { %v572_v1 = vpop.xlane.xlu1 %571 }
 0x928   :  { %vm573_vm8 = vcmp.eq.f32.partialorder %v570_v62, %v572_v1  ;;  %v578_v3 = vcvt.f32.s32 %v572_v1 }
 0x929   :  { %v574_v0 = vsel %vm573_vm8, %v569_v2, inf }
 0x92a   :  { %575 = vmin.xlane.f32.xlu2 %v574_v0  ;;  %v579_v5 = vshll.u32 %v578_v3, 16 }
 0x99d   :  { %v576_v4 = vpop.xlane.xlu2 %575 }
 0x99e   :  { %v577_v6 = vcvt.f32.s32 %v576_v4 }
 0x9a0   :  { %v580_v7 = vadd.s32 %v579_v5, %v577_v6 }
 0x9a2   :  { %v581_v8 = vrot.slane %v580_v7, 4 }
 0x9a4   :  { %vm582_vm9 = vcmp.lt.s32.totalorder %v580_v7, %v581_v8 }
 0x9a5   :  { %v583_v9 = vsel %vm582_vm9, %v580_v7, %v581_v8 }
 0x9a6   :  { %v584_v10 = vrot.slane %v583_v9, 2 }
 0x9a8   :  { %vm585_vm10 = vcmp.lt.s32.totalorder %v583_v9, %v584_v10 }
 0x9a9   :  { %v586_v11 = vsel %vm585_vm10, %v583_v9, %v584_v10 }
 0x9aa   :  { %v587_v12 = vrot.slane %v586_v11, 1 }
 0x9ac   :  { %vm588_vm11 = vcmp.lt.s32.totalorder %v586_v11, %v587_v12 }
 0x9ad   :  { %v589_v13 = vsel %vm588_vm11, %v586_v11, %v587_v12 }
 0x9ae   :  { %812 = vpush %v589_v13 }
 0x9df   :  { %s813_s22 = spop %812 }
 0x9e0   :  { %593 = sst [smem:[#allocation15 + $0x4]] %s813_s22  ;;  %s757_s23 = scalar_lea.vmem [#allocation2], %s813_s22 }
 0x9e1   :  { %v769_v14 = vld [vmem:[%s757_s23 + $0x50] sm:$0x1] }
 0x9e2   :  { %v597_v15 = vsel %vm416_vm1, %v769_v14, -inf  ;;  %627 = vst [vmem:[#allocation14 + $0x5] sm:$0x1] %v769_v14 }
 0x9e3   :  { %598 = vmax.xlane.f32.xlu0 %v597_v15 }
 0xa56   :  { %v599_v16 = vpop.xlane.xlu0 %598 }
 0xa57   :  { %vm600_vm12 = vcmp.eq.f32.partialorder %v769_v14, %v599_v16 }
 0xa58   :  { %v601_v17 = vsel %vm600_vm12, %v1119_v32, 128 }
 0xa59   :  { %v602_v18 = vsel %vm416_vm1, %v601_v17, 2147483647 }
 0xa5a   :  { %v604_v19 = vshra.s32 %v602_v18, 16  ;;  %v603_v21 = vand.u32 65535, %v602_v18 }
 0xa5c   :  { %v606_v20 = vcvt.s32.f32 %v604_v19  ;;  %v605_v23 = vcvt.s32.f32 %v603_v21 }
 0xa5e   :  { %607 = vmin.xlane.f32.xlu1 %v606_v20 }
 0xad1   :  { %v608_v22 = vpop.xlane.xlu1 %607 }
 0xad2   :  { %vm609_vm13 = vcmp.eq.f32.partialorder %v606_v20, %v608_v22  ;;  %v614_v25 = vcvt.f32.s32 %v608_v22 }
 0xad3   :  { %v610_v24 = vsel %vm609_vm13, %v605_v23, inf }
 0xad4   :  { %611 = vmin.xlane.f32.xlu2 %v610_v24  ;;  %v615_v27 = vshll.u32 %v614_v25, 16 }
 0xb47   :  { %v612_v26 = vpop.xlane.xlu2 %611 }
 0xb48   :  { %v613_v28 = vcvt.f32.s32 %v612_v26 }
 0xb4a   :  { %v616_v29 = vadd.s32 %v615_v27, %v613_v28 }
 0xb4c   :  { %v617_v30 = vrot.slane %v616_v29, 4 }
 0xb4e   :  { %vm618_vm14 = vcmp.lt.s32.totalorder %v616_v29, %v617_v30 }
 0xb4f   :  { %v619_v31 = vsel %vm618_vm14, %v616_v29, %v617_v30 }
 0xb50   :  { %v620_v33 = vrot.slane %v619_v31, 2 }
 0xb52   :  { %vm621_vm15 = vcmp.lt.s32.totalorder %v619_v31, %v620_v33 }
 0xb53   :  { %v622_v34 = vsel %vm621_vm15, %v619_v31, %v620_v33 }
 0xb54   :  { %v623_v35 = vrot.slane %v622_v34, 1 }
 0xb56   :  { %vm624_vm0 = vcmp.lt.s32.totalorder %v622_v34, %v623_v35 }
 0xb57   :  { %v625_v36 = vsel %vm624_vm0, %v622_v34, %v623_v35 }
 0xb58   :  { %814 = vpush %v625_v36 }
 0xb89   :  { %s815_s2 = spop %814 }
 0xb8a   :  { %629 = sst [smem:[#allocation15 + $0x5]] %s815_s2  ;;  %s759_s24 = scalar_lea.vmem [#allocation2], %s815_s2 }
 0xb8b   :  { %v770_v37 = vld [vmem:[%s759_s24 + $0x60] sm:$0x1] }
 0xb8c   :  { %v633_v38 = vsel %vm416_vm1, %v770_v37, -inf  ;;  %663 = vst [vmem:[#allocation14 + $0x6] sm:$0x1] %v770_v37 }
 0xb8d   :  { %634 = vmax.xlane.f32.xlu0 %v633_v38 }
 0xc00   :  { %v635_v39 = vpop.xlane.xlu0 %634 }
 0xc01   :  { %vm636_vm2 = vcmp.eq.f32.partialorder %v770_v37, %v635_v39 }
 0xc02   :  { %v637_v40 = vsel %vm636_vm2, %v1119_v32, 128 }
 0xc03   :  { %v638_v41 = vsel %vm416_vm1, %v637_v40, 2147483647 }
 0xc04   :  { %v640_v42 = vshra.s32 %v638_v41, 16  ;;  %v639_v44 = vand.u32 65535, %v638_v41 }
 0xc06   :  { %v642_v43 = vcvt.s32.f32 %v640_v42  ;;  %v641_v46 = vcvt.s32.f32 %v639_v44 }
 0xc08   :  { %643 = vmin.xlane.f32.xlu1 %v642_v43 }
 0xc7b   :  { %v644_v45 = vpop.xlane.xlu1 %643 }
 0xc7c   :  { %vm645_vm3 = vcmp.eq.f32.partialorder %v642_v43, %v644_v45  ;;  %v650_v48 = vcvt.f32.s32 %v644_v45 }
 0xc7d   :  { %v646_v47 = vsel %vm645_vm3, %v641_v46, inf }
 0xc7e   :  { %647 = vmin.xlane.f32.xlu2 %v646_v47  ;;  %v651_v50 = vshll.u32 %v650_v48, 16 }
 0xcf1   :  { %v648_v49 = vpop.xlane.xlu2 %647 }
 0xcf2   :  { %v649_v51 = vcvt.f32.s32 %v648_v49 }
 0xcf4   :  { %v652_v52 = vadd.s32 %v651_v50, %v649_v51 }
 0xcf6   :  { %v653_v53 = vrot.slane %v652_v52, 4 }
 0xcf8   :  { %vm654_vm4 = vcmp.lt.s32.totalorder %v652_v52, %v653_v53 }
 0xcf9   :  { %v655_v54 = vsel %vm654_vm4, %v652_v52, %v653_v53 }
 0xcfa   :  { %v656_v55 = vrot.slane %v655_v54, 2 }
 0xcfc   :  { %vm657_vm5 = vcmp.lt.s32.totalorder %v655_v54, %v656_v55 }
 0xcfd   :  { %v658_v57 = vsel %vm657_vm5, %v655_v54, %v656_v55 }
 0xcfe   :  { %v659_v58 = vrot.slane %v658_v57, 1 }
 0xd00   :  { %vm660_vm6 = vcmp.lt.s32.totalorder %v658_v57, %v659_v58 }
 0xd01   :  { %v661_v56 = vsel %vm660_vm6, %v658_v57, %v659_v58 }
 0xd02   :  { %816 = vpush %v661_v56 }
 0xd33   :  { %s817_s25 = spop %816 }
 0xd34   :  { %665 = sst [smem:[#allocation15 + $0x6]] %s817_s25  ;;  %s761_s26 = scalar_lea.vmem [#allocation2], %s817_s25 }
 0xd35   :  { %v771_v59 = vld [vmem:[%s761_s26 + $0x70] sm:$0x1] }
 0xd36   :  { %v669_v60 = vsel %vm416_vm1, %v771_v59, -inf  ;;  %699 = vst [vmem:[#allocation14 + $0x7] sm:$0x1] %v771_v59 }
 0xd37   :  { %670 = vmax.xlane.f32.xlu0 %v669_v60 }
 0xd3d   :  { %v702_v61 = vld [vmem:[#allocation14] sm:$0xff] }
 0xd3f   :  { %703 = vmax.xlane.f32.xlu0 %v702_v61 }
 0xdaa   :  { %v671_v62 = vpop.xlane.xlu0 %670 }
 0xdab   :  { %vm672_vm7 = vcmp.eq.f32.partialorder %v771_v59, %v671_v62 }
 0xdac   :  { %v673_v63 = vsel %vm672_vm7, %v1119_v32, 128 }
 0xdad   :  { %v674_v1 = vsel %vm416_vm1, %v673_v63, 2147483647 }
 0xdae   :  { %v676_v2 = vshra.s32 %v674_v1, 16  ;;  %v675_v7 = vand.u32 65535, %v674_v1 }
 0xdb0   :  { %v678_v0 = vcvt.s32.f32 %v676_v2  ;;  %v677_v9 = vcvt.s32.f32 %v675_v7 }
 0xdb2   :  { %679 = vmin.xlane.f32.xlu1 %v678_v0  ;;  %v704_v3 = vpop.xlane.xlu0 %703 }
 0xdb3   :  { %v705_v4 = vsub.f32 %v702_v61, %v704_v3 }
 0xdb5   :  { %v706_v5 = vmul.f32 1.442695, %v705_v4 }
 0xdb7   :  { %831 = vpow2.f32 %v706_v5 }
 0xdbd   :  { %v832_v6 = vpop.eup %831 }
 0xdbe   :  { %708 = vadd.xlane.f32.xlu1 %v832_v6 }
 0xe25   :  { %v680_v8 = vpop.xlane.xlu1 %679 }
 0xe26   :  { %vm681_vm8 = vcmp.eq.f32.partialorder %v678_v0, %v680_v8  ;;  %v686_v14 = vcvt.f32.s32 %v680_v8 }
 0xe27   :  { %v682_v10 = vsel %vm681_vm8, %v677_v9, inf }
 0xe28   :  { %683 = vmin.xlane.f32.xlu2 %v682_v10  ;;  %v687_v16 = vshll.u32 %v686_v14, 16 }
 0xe31   :  { %v709_v11 = vpop.xlane.xlu1 %708 }
 0xe32   :  { %833 = vlog2.f32 %v709_v11 }
 0xe38   :  { %v834_v32 = vpop.eup %833 }
 0xe39   :  { %v711_v12 = vmul.f32 0.6931472, %v834_v32 }
 0xe3b   :  { %v712_v13 = vsub.f32 %v705_v4, %v711_v12 }
 0xe3d   :  { %713 = vst [vmem:[#allocation14] sm:$0xff] %v712_v13 }
 0xe3e   :  { %724 = dma.vmem_to_hbm [thread:$0]  %s720_s30, 128, %s722_s28, [#allocation6]  }
 0xe9b   :  { %v684_v15 = vpop.xlane.xlu2 %683 }
 0xe9c   :  { %v685_v17 = vcvt.f32.s32 %v684_v15 }
 0xe9e   :  { %v688_v18 = vadd.s32 %v687_v16, %v685_v17 }
 0xea0   :  { %v689_v19 = vrot.slane %v688_v18, 4 }
 0xea2   :  { %vm690_vm1 = vcmp.lt.s32.totalorder %v688_v18, %v689_v19 }
 0xea3   :  { %v691_v20 = vsel %vm690_vm1, %v688_v18, %v689_v19 }
 0xea4   :  { %v692_v21 = vrot.slane %v691_v20, 2 }
 0xea6   :  { %vm693_vm9 = vcmp.lt.s32.totalorder %v691_v20, %v692_v21 }
 0xea7   :  { %v694_v22 = vsel %vm693_vm9, %v691_v20, %v692_v21 }
 0xea8   :  { %v695_v23 = vrot.slane %v694_v22, 1 }
 0xeaa   :  { %vm696_vm10 = vcmp.lt.s32.totalorder %v694_v22, %v695_v23 }
 0xeab   :  { %v697_v24 = vsel %vm696_vm10, %v694_v22, %v695_v23 }
 0xeac   :  { %818 = vpush %v697_v24 }
 0xedd   :  { %s819_s11 = spop %818 }
 0xede   :  { %701 = sst [smem:[#allocation15 + $0x7]] %s819_s11 }
 0xedf   :  { %733 = dma.smem_to_hbm %s1009_s3, 16, %s731_s1, [#allocation7]  }
 0xee0   :  { %997 = dma.done.wait [#allocation6], 128  }
 0xee1   :  { %998 = vsyncadd [#allocation6], 4294967168 }
 0xee2   :  { %999 = dma.done.wait [#allocation7], 16  }
 0xee3   :  { %1000 = vsyncadd [#allocation7], 4294967280 }
 0xee4   :  { %742 = sfence }
 0xee5   :  { %743 = vsyncpa [#allocation5], 1 }
 0xee6   :  { %744 = vsyncpa [#allocation9], 1 }
 0xee7   :  { %745 = vsyncpa [#allocation12], 1 }
 0xee8   :  { %746 = vsyncpa [#allocation6], 1 }
 0xee9   :  { %747 = vsyncpa [#allocation7], 1 }

</bundles_post_ra>
